<compile_context>
chip_gen: v6e
topology: v6e:2x2x1
jax: 0.10.0
libtpu: 0.0.40
codegen_flags: <defaults>
</compile_context>

<pallas_src>
import functools
import math

import jax
import jax.numpy as jnp
from jax.experimental import pallas as pl
from jax.experimental.pallas import tpu as pltpu


def _phase_matmul_kernel(p_ref, w_ref, b_ref, o_ref):
    """One lane-dense MXU matmul per grid step.

    p_ref: (TM, K)       bf16 im2col patches (K = 3*3*Cin)
    w_ref: (K, n_cols)   bf16 fused phase weights (n_cols = round_up(s^2*Cout, 128))
    b_ref: (1, n_cols)   f32  fused bias (zero in padded columns)
    o_ref: (TM, n_cols)  bf16 output tile (f32 accumulate + bias, cast on store)
    """
    acc = jnp.dot(p_ref[...], w_ref[...], preferred_element_type=jnp.float32)
    o_ref[...] = (acc + b_ref[...]).astype(o_ref.dtype)


def _round_up(x, m):
    return ((x + m - 1) // m) * m


@functools.partial(jax.jit, static_argnames=("scale_factor",))
def resize_conv2d(x_nchw, weight_oihw, bias, *, scale_factor):
    """ResizeConv2d forward: nearest-upsample(scale_factor) then Conv2d(k=3, stride=1, pad=1).

    x_nchw: (N, Cin, H, W); weight_oihw: (Cout, Cin, 3, 3); bias: (Cout,).
    Returns (N, Cout, H*s, W*s) float32 (NCHW, PyTorch convention).
    """
    s = int(scale_factor)
    assert s == scale_factor and s >= 1, (
        "only integer nearest upsampling has a phase-kernel equivalent")
    N, Cin, H, W = x_nchw.shape
    Cout, _, KH, KW = weight_oihw.shape
    assert (KH, KW) == (3, 3), "module hardcodes padding=1; only kernel_size=3 is supported"
    # TODO(synk): only mode='nearest' is implemented (the Deep-SVDD usage); other
    # F.interpolate modes have no fused phase-kernel equivalent here.

    LANE = 128
    n_phase = s * s
    n_cols_raw = n_phase * Cout
    n_cols = _round_up(n_cols_raw, LANE)          # flat column padding (review item)
    K = 9 * Cin

    # --- phase ("sub-pixel") weight transform: fold the nearest upsample into the weights.
    # A[p, w, k] = 1 iff tap k of the 3x3 conv, applied at output phase p, reads the original
    # pixel at relative offset (w - 1), i.e. floor((p + k - 1) / s) == w - 1.
    A = jnp.array(
        [[[1.0 if (p + k - 1) // s == w - 1 else 0.0 for k in range(3)]
          for w in range(3)]
         for p in range(s)],
        dtype=jnp.float32)                                                  # (s, 3, 3)
    w_hwio = jnp.transpose(weight_oihw, (2, 3, 1, 0)).astype(jnp.float32)   # (3, 3, Cin, Cout)
    # (py, px, wy, wx, cin, cout)
    w_fused = jnp.einsum('pak,qbl,klcd->pqabcd', A, A, w_hwio)
    # contraction index order = (wy, wx, cin); column index order = (py, px, cout)
    w_mat = jnp.transpose(w_fused, (2, 3, 4, 0, 1, 5)).reshape(K, n_cols_raw)
    w_mat = jnp.pad(w_mat, ((0, 0), (0, n_cols - n_cols_raw))).astype(jnp.bfloat16)

    b_fused = jnp.pad(jnp.tile(bias.astype(jnp.float32), (n_phase,)),
                      (0, n_cols - n_cols_raw)).reshape(1, n_cols)

    # --- im2col on the ORIGINAL (small) input: NHWC, pad 1, 3x3 window -> 9*Cin lanes.
    x = jnp.transpose(x_nchw, (0, 2, 3, 1))                                 # NHWC (small)
    xp = jnp.pad(x, ((0, 0), (1, 1), (1, 1), (0, 0)))
    cols = [xp[:, wy:wy + H, wx:wx + W, :] for wy in range(3) for wx in range(3)]
    patches = jnp.concatenate(cols, axis=-1).reshape(N, H * W, K)

    # --- flatten (N, M) into one row axis with a large row tile (review item).
    M = H * W
    TM = min(512, _round_up(M, LANE))             # 256 at the toy shape, 512 for big maps
    Mp = _round_up(M, TM)                         # per-batch pad so tiles never straddle batches
    if Mp != M:
        patches = jnp.pad(patches, ((0, 0), (0, Mp - M), (0, 0)))
    patches = patches.reshape(N * Mp, K).astype(jnp.bfloat16)
    total_rows = N * Mp
    n_steps = total_rows // TM                    # >= 2 for N >= 2 (keeps both v7x TCs busy)

    # Explicit scoped-VMEM budget: double-buffered lhs + out tiles, double-buffered
    # (tiny) weight/bias, plus generous headroom; clamped to the v7x 64 MiB ceiling.
    est = (2 * TM * K * 2            # lhs bf16, 2 buffers
           + 2 * TM * n_cols * 2     # out bf16, 2 buffers
           + 2 * K * n_cols * 2      # weight bf16, 2 buffers
           + 2 * n_cols * 4)         # bias f32, 2 buffers
    vmem_limit = int(min(64 << 20, max(16 << 20, 4 * est)))

    out = pl.pallas_call(
        _phase_matmul_kernel,
        out_shape=jax.ShapeDtypeStruct((total_rows, n_cols), jnp.bfloat16),
        grid_spec=pltpu.PrefetchScalarGridSpec(
            num_scalar_prefetch=0,
            grid=(n_steps,),
            in_specs=[
                pl.BlockSpec((TM, K), lambda i: (i, 0)),
                pl.BlockSpec((K, n_cols), lambda i: (0, 0)),
                pl.BlockSpec((1, n_cols), lambda i: (0, 0)),
            ],
            out_specs=pl.BlockSpec((TM, n_cols), lambda i: (i, 0)),
        ),
        compiler_params=pltpu.CompilerParams(
            dimension_semantics=("parallel",),
            vmem_limit_bytes=vmem_limit,
        ),
    )(patches, w_mat, b_fused)

    # --- unpack in ONE transpose pass (review item): rows -> (N, H, W); columns ->
    # (py, px, cout); drop column padding; interleave phases and go straight to NCHW.
    out = out.reshape(N, Mp, n_cols)[:, :M, :n_cols_raw]
    out = out.reshape(N, H, W, s, s, Cout)                 # (N, H, W, py, px, C)
    out = jnp.transpose(out, (0, 5, 1, 3, 2, 4))           # (N, C, H, py, W, px)
    out = out.reshape(N, Cout, H * s, W * s)
    return out.astype(jnp.float32)


def _reference(x_nchw, weight_oihw, bias, *, scale_factor, padding=1):
    """Pure-JAX reference (nearest upsample + lax conv) for correctness check."""
    x = jnp.repeat(x_nchw, scale_factor, axis=2)
    x = jnp.repeat(x, scale_factor, axis=3)
    out = jax.lax.conv_general_dilated(
        x, weight_oihw,
        window_strides=(1, 1),
        padding=[(padding, padding), (padding, padding)],
        dimension_numbers=("NCHW", "OIHW", "NCHW"),
    )
    return out + bias.reshape(1, -1, 1, 1)


if __name__ == "__main__":
    # Small shapes consistent with the module: batch=2, Cin=4, H=W=16, Cout=8,
    # kernel_size=3, scale_factor=2.
    N, Cin, H, W = 2, 4, 16, 16
    Cout, Ksz = 8, 3
    scale = 2

    key = jax.random.PRNGKey(0)
    kx, kw, kb = jax.random.split(key, 3)

    x = jax.random.normal(kx, (N, Cin, H, W), dtype=jnp.float32)

    # Deterministic Conv2d-style init: U(-bound, bound), bound = 1/sqrt(Cin*K*K).
    fan_in = Cin * Ksz * Ksz
    bound = 1.0 / (fan_in ** 0.5)
    weight = jax.random.uniform(kw, (Cout, Cin, Ksz, Ksz), jnp.float32, -bound, bound)
    bias = jax.random.uniform(kb, (Cout,), jnp.float32, -bound, bound)

    out = resize_conv2d(x, weight, bias, scale_factor=scale)
    out = jax.block_until_ready(out)

    ref = _reference(x, weight, bias, scale_factor=scale, padding=1)
    assert out.shape == (N, Cout, H * scale, W * scale), out.shape
    max_err = float(jnp.max(jnp.abs(out - ref)))
    # bf16 MXU operands + bf16 output store (f32 accumulation / bias): expect ~1e-3..1e-2
    # abs error vs the f32 reference.
    assert jnp.allclose(out, ref, atol=3e-2, rtol=3e-2), max_err

    print("KERNEL_OK")
</pallas_src>

<mosaic_0001>
module attributes {stable_mosaic.version = 11 : i64} {
  func.func @_phase_matmul_kernel(%arg0: i32, %arg1: memref<256x36xbf16, #tpu.memory_space<vmem>>, %arg2: memref<36x128xbf16, #tpu.memory_space<vmem>>, %arg3: memref<1x128xf32, #tpu.memory_space<vmem>>, %arg4: memref<256x128xbf16, #tpu.memory_space<vmem>>) attributes {dimension_semantics = [#tpu.dimension_semantics<parallel>], iteration_bounds = array<i64: 2>, scalar_prefetch = 0 : i64, scratch_operands = 0 : i64, tpu.core_type = #tpu.core_type<tc>, window_params = [{transform_indices = @transform_0, window_bounds = array<i64: 256, 36>}, {pipeline_mode = #tpu.pipeline_mode<synchronous>, transform_indices = @transform_1, window_bounds = array<i64: 36, 128>}, {pipeline_mode = #tpu.pipeline_mode<synchronous>, transform_indices = @transform_2, window_bounds = array<i64: 1, 128>}, {transform_indices = @transform_3, window_bounds = array<i64: 256, 128>}]} {
    %c0 = arith.constant 0 : index
    %c0_0 = arith.constant 0 : index
    %0 = vector.load %arg1[%c0, %c0_0] : memref<256x36xbf16, #tpu.memory_space<vmem>>, vector<256x36xbf16>
    %c0_1 = arith.constant 0 : index
    %c0_2 = arith.constant 0 : index
    %1 = vector.load %arg2[%c0_1, %c0_2] : memref<36x128xbf16, #tpu.memory_space<vmem>>, vector<36x128xbf16>
    %cst = arith.constant dense<0.000000e+00> : vector<256x128xf32>
    %2 = tpu.matmul %0, %1, %cst {dimension_numbers = #tpu.dot_dimension_numbers<[1], [0], [0], [1], [0, 0, 1, 1], [], []>} : vector<256x36xbf16>, vector<36x128xbf16>, vector<256x128xf32> -> vector<256x128xf32>
    %c0_3 = arith.constant 0 : index
    %c0_4 = arith.constant 0 : index
    %3 = vector.load %arg3[%c0_3, %c0_4] : memref<1x128xf32, #tpu.memory_space<vmem>>, vector<1x128xf32>
    %4 = vector.broadcast %3 : vector<1x128xf32> to vector<256x128xf32>
    %5 = arith.addf %2, %4 : vector<256x128xf32>
    %6 = arith.truncf %5 : vector<256x128xf32> to vector<256x128xbf16>
    %c0_5 = arith.constant 0 : index
    %c0_6 = arith.constant 0 : index
    %7 = vector.load %arg4[%c0_5, %c0_6] : memref<256x128xbf16, #tpu.memory_space<vmem>>, vector<256x128xbf16>
    tpu.vector_store %arg4[%c0_5, %c0_6], %6 {strides = array<i32>} : memref<256x128xbf16, #tpu.memory_space<vmem>>, vector<256x128xbf16>,
    return
  }
  func.func @transform_0(%arg0: i32) -> (i32, i32) {
    %c0_i32 = arith.constant 0 : i32
    %c0_i32_0 = arith.constant 0 : i32
    return %arg0, %c0_i32 : i32, i32
  }
  func.func @transform_1(%arg0: i32) -> (i32, i32) {
    %c0_i32 = arith.constant 0 : i32
    %c0_i32_0 = arith.constant 0 : i32
    %c0_i32_1 = arith.constant 0 : i32
    return %c0_i32, %c0_i32_0 : i32, i32
  }
  func.func @transform_2(%arg0: i32) -> (i32, i32) {
    %c0_i32 = arith.constant 0 : i32
    %c0_i32_0 = arith.constant 0 : i32
    %c0_i32_1 = arith.constant 0 : i32
    return %c0_i32, %c0_i32_0 : i32, i32
  }
  func.func @transform_3(%arg0: i32) -> (i32, i32) {
    %c0_i32 = arith.constant 0 : i32
    %c0_i32_0 = arith.constant 0 : i32
    return %arg0, %c0_i32 : i32, i32
  }
}

</mosaic_0001>

<bundles_post_ra>
// kernel: tile.8
= control target key start
LH: loop header
LB: loop body
LE: loop exit
PB: predicated region body
PF: predicated region fallthrough
CT: control target
= control target key end

     0   :  { %s22_s0 = inlined_call_operand.vmem [shape: f32[8], index: 0, kind: input, shape index: {}]   ;;  %s23_s1 = inlined_call_operand.vmem [shape: f32[4,8], index: 1, kind: output, shape index: {}]  }
   0x1   :  { %v4_v0 = vld [vmem:[%s22_s0] ss:$0 sm:$0xff] }
   0x2   :  { %5 = vst [vmem:[%s23_s1] sm:$0xf] %v4_v0 }

// kernel: tile.9
= control target key start
LH: loop header
LB: loop body
LE: loop exit
PB: predicated region body
PF: predicated region fallthrough
CT: control target
= control target key end

     0   :  { %vm8_vm0 = vcmask 64512   ;;  %s40_s8 = smov 8   ;;  %s41_s9 = smov 16   ;;  %vm14_vm1 = vcmask 261312   ;;  %vm20_vm2 = vcmask 195712   ;;  %vm26_vm3 = vcmask 130112   ;;  %s58_s0 = inlined_call_operand.vmem [shape: f32[4,8], index: 0, kind: input, shape index: {}]   ;;  %s59_s1 = inlined_call_operand.vmem [shape: f32[32], index: 1, kind: output, shape index: {}]  }
   0x1   :  { %v5_v0 = vld [vmem:[%s58_s0] sm:$0xf]  ;;  %s39_s0 = smov 24  }
   0x2   :  { %6 = vst [vmem:[#allocation1] sm:$0xf] %v5_v0 }
   0x9   :  { %v11_v1 = vld [vmem:[#allocation1 + $0x3] sm:$0x1]   ;;  %v23_v2 = vld [vmem:[#allocation1 + $0x1] sm:$0x1]   ;;  %v7_v3 = vld [vmem:[#allocation1] sm:$0x1]  }
   0xa   :  { %12 = vrot.lane.b32.xlu0 %v11_v1, %s39_s0  ;;  %24 = vrot.lane.b32.xlu1 %v23_v2, %s40_s8  ;;  %v17_v4 = vld [vmem:[#allocation1 + $0x2] sm:$0x1]   ;;  %9 = vst.msk [vmem:[#allocation0] sm:$0x1] %vm8_vm0, %v7_v3  }
   0xe   :  { %18 = vrot.lane.b32.xlu0 %v17_v4, %s41_s9 }
  0x7c   :  { %v13_v5 = vpop.permute.xlu0 %12   ;;  %v25_v6 = vpop.permute.xlu1 %24  }
  0x7d   :  { %15 = vst.msk [vmem:[#allocation0] sm:$0x1] %vm14_vm1, %v13_v5  }
  0x80   :  { %v19_v7 = vpop.permute.xlu0 %18  }
  0x81   :  { %21 = vst.msk [vmem:[#allocation0] sm:$0x1] %vm20_vm2, %v19_v7  }
  0x82   :  { %27 = vst.msk [vmem:[#allocation0] sm:$0x1] %vm26_vm3, %v25_v6  }
  0x89   :  { %v32_v8 = vld [vmem:[#allocation0] sm:$0x1] }
  0x8a   :  { %35 = vst [vmem:[%s59_s1] sm:$0x1] %v32_v8 }

// kernel: resize_conv2d.1
= control target key start
LH: loop header
LB: loop body
LE: loop exit
PB: predicated region body
PF: predicated region fallthrough
CT: control target
= control target key end

     0   :  { %s1070_s12 = smov 0   ;;  %s1192_s0 = inlined_call_operand.vmem [shape: bf16[512,36], index: 0, kind: input, shape index: {}]   ;;  %s1193_s1 = inlined_call_operand.vmem [shape: bf16[36,128], index: 1, kind: input, shape index: {}]   ;;  %s1194_s2 = inlined_call_operand.vmem [shape: f32[1,128], index: 2, kind: input, shape index: {}]   ;;  %s1195_s3 = inlined_call_operand.vmem [shape: bf16[512,128], index: 3, kind: output, shape index: {}]  }
   0x1 LB: > { %s744_s13 = sadd.s32 4294967295, %s1048_s12   ;;  %p748_p0 = scmp.ge.s32.totalorder %s1048_s12, 1  ;;  %s1048_s12 = sphi %s1070_s12, %s13_s12  }
   0x2   : > { %p138_p1 = scmp.lt.s32.totalorder %s1048_s12, 3 }
   0x4   : > { %p139_p2 = pnand %p748_p0, %p138_p1 }
   0x5   : > { %s749_s18 = sshll.u32 (!%p139_p2), %s744_s13, 5 }
   0x6   : > { %142 = sbr.rel (%p139_p2) target bundleno = 252 (0xfc), region = 32  ;;  %p163_p3 = scmp.lt.s32.totalorder (!%p139_p2), %s749_s18, 63 }
   0xb   : > { %v1023_v0 = vld [vmem:[%s1193_s1 + $0x10] ss:$0 sps:$4 sm:$0x33]   ;;  %vm363_vm0 = vcmask 1041408   ;;  %v1024_v1 = vld [vmem:[%s1193_s1 + $0x8] sm:$0xff]   ;;  %v1025_v3 = vld [vmem:[%s1193_s1] sm:$0xff]  }
   0xc   : > { %1013 = vmatprep.subr.msk.bf16.mxu0 %vm363_vm0, %v1023_v0  ;;  %1014 = vmatprep.subr.msk.bf16.mxu1 %vm363_vm0, %v1023_v0  ;;  %v365_v2 = vsel %vm363_vm0, %v1023_v0, 0  ;;  %s1197_s18 = smov (!%p163_p3, %s749_s18), 63  ;;  %vm314_vm1 = vcmask 293888   ;;  %v1132_v22 = vld [vmem:[%s1194_s2] ss:$0 sm:$0xff] }
   0xd   : > { %970 = vmatpush3.bf16.msra.mxu0 %v365_v2  ;;  %1010 = vmatpush3.bf16.msra.mxu1 %v365_v2  ;;  %s750_s21 = sshll.u32 %s1197_s18, 2 }
   0xe   : > { %971 = vmatprep.subr.bf16.mxu0 %v1024_v1  ;;  %1008 = vmatprep.subr.bf16.mxu1 %v1024_v1  ;;  %s1095_s24 = scalar_lea.vmem %s1192_s0, %s750_s21  ;;  %s1145_s29 = scalar_lea.vmem %s1195_s3, %s750_s21 }
   0xf   : > { %v1026_v4 = vld [vmem:[%s1095_s24] sm:$0xff]   ;;  %v1028_v6 = vld [vmem:[%s1095_s24 + $0x8] sm:$0xff]   ;;  %v1030_v8 = vld [vmem:[%s1095_s24 + $0x10] sm:$0xff]  }
  0x10   : > { %v1027_v5 = vld [vmem:[%s1095_s24 + $0x40] sm:$0xff]   ;;  %975 = vmatprep.mubr.msk.bf16.mxu0 %vm314_vm1, %v1026_v4  ;;  %v1029_v7 = vld [vmem:[%s1095_s24 + $0x48] sm:$0xff]   ;;  %v1031_v9 = vld [vmem:[%s1095_s24 + $0x50] sm:$0xff]  }
  0x11   : > { %972 = vmatpush3.bf16.msra.mxu0 %v1024_v1  ;;  %1011 = vmatpush3.bf16.msra.mxu1 %v1024_v1  ;;  %v1032_v10 = vld [vmem:[%s1095_s24 + $0x18] sm:$0xff]   ;;  %v1034_v12 = vld [vmem:[%s1095_s24 + $0x20] sm:$0xff]   ;;  %v1036_v14 = vld [vmem:[%s1095_s24 + $0x28] sm:$0xff]  }
  0x12   : > { %973 = vmatprep.subr.bf16.mxu0 %v1025_v3  ;;  %1009 = vmatprep.subr.bf16.mxu1 %v1025_v3  ;;  %v1033_v11 = vld [vmem:[%s1095_s24 + $0x58] sm:$0xff]   ;;  %v1035_v13 = vld [vmem:[%s1095_s24 + $0x60] sm:$0xff]   ;;  %v1037_v15 = vld [vmem:[%s1095_s24 + $0x68] sm:$0xff]  }
  0x13   : > { %991 = vmatprep.mubr.msk.bf16.mxu1 %vm314_vm1, %v1027_v5  ;;  %v1038_v16 = vld [vmem:[%s1095_s24 + $0x30] sm:$0xff]   ;;  %v1040_v18 = vld [vmem:[%s1095_s24 + $0x38] sm:$0xff]  }
  0x14   : > { %v1039_v17 = vld [vmem:[%s1095_s24 + $0x70] sm:$0xff]   ;;  %v1041_v19 = vld [vmem:[%s1095_s24 + $0x78] sm:$0xff]  }
  0x15   : > { %974 = vmatpush3.bf16.msra.mxu0 %v1025_v3  ;;  %1012 = vmatpush3.bf16.msra.mxu1 %v1025_v3 }
  0x18   : > { %976 = vmatmul.mubr.msk.bf16.vlgmr.msra.gmra.mxu0 %vm314_vm1, %v1028_v6  ;;  %992 = vmatmul.mubr.msk.bf16.vlgmr.msra.gmra.mxu1 %vm314_vm1, %v1029_v7 }
  0x19   : > { %979 = vmatprep.mubr.msk.bf16.mxu0 %vm314_vm1, %v1030_v8  ;;  %995 = vmatprep.mubr.msk.bf16.mxu1 %vm314_vm1, %v1031_v9 }
  0x20   : > { %980 = vmatmul.mubr.msk.bf16.gmra.mxu0 %vm314_vm1, %v1032_v10  ;;  %996 = vmatmul.mubr.msk.bf16.gmra.mxu1 %vm314_vm1, %v1033_v11 }
  0x21   : > { %983 = vmatprep.mubr.msk.bf16.mxu0 %vm314_vm1, %v1034_v12  ;;  %999 = vmatprep.mubr.msk.bf16.mxu1 %vm314_vm1, %v1035_v13 }
  0x28   : > { %984 = vmatmul.mubr.msk.bf16.gmra.mxu0 %vm314_vm1, %v1036_v14  ;;  %1000 = vmatmul.mubr.msk.bf16.gmra.mxu1 %vm314_vm1, %v1037_v15 }
  0x29   : > { %987 = vmatprep.mubr.msk.bf16.mxu0 %vm314_vm1, %v1038_v16  ;;  %1003 = vmatprep.mubr.msk.bf16.mxu1 %vm314_vm1, %v1039_v17 }
  0x30   : > { %988 = vmatmul.mubr.msk.bf16.gmra.mxu0 %vm314_vm1, %v1040_v18  ;;  %1004 = vmatmul.mubr.msk.bf16.gmra.mxu1 %vm314_vm1, %v1041_v19 }
  0xd8   : > { %v977_v20 = vpop.f32.mrf.mxu0  ;;  %v993_v21 = vpop.f32.mrf.mxu1 }
  0xd9   : > { %v410_v27 = vadd.f32 %v977_v20, %v1132_v22  ;;  %v474_v28 = vadd.f32 %v993_v21, %v1132_v22 }
  0xda   : > { %v401_v23 = vpop.f32.mrf.mxu0  ;;  %v465_v24 = vpop.f32.mrf.mxu1 }
  0xdb   : > { %v402_v31 = vadd.f32 %v1132_v22, %v401_v23  ;;  %v466_v32 = vadd.f32 %v1132_v22, %v465_v24 }
  0xdc   : > { %v978_v25 = vpop.f32.mrf.mxu0  ;;  %v994_v26 = vpop.f32.mrf.mxu1 }
  0xdd   : > { %v413_v29 = vadd.f32 %v978_v25, %v1132_v22  ;;  %v477_v30 = vadd.f32 %v994_v26, %v1132_v22 }
  0xde   : > { %v404_v33 = vpop.f32.mrf.mxu0  ;;  %v468_v34 = vpop.f32.mrf.mxu1 }
  0xdf   : > { %v863_v35 = vpack.c.bf16 %v413_v29, %v410_v27  ;;  %v903_v36 = vpack.c.bf16 %v477_v30, %v474_v28  ;;  %v405_v37 = vadd.f32 %v1132_v22, %v404_v33  ;;  %v469_v38 = vadd.f32 %v1132_v22, %v468_v34 }
  0xe0   : > { %v981_v39 = vpop.f32.mrf.mxu0  ;;  %v997_v40 = vpop.f32.mrf.mxu1 }
  0xe1   : > { %935 = vst [vmem:[%s1145_s29 + $0x8] sm:$0xff] %v863_v35   ;;  %943 = vst [vmem:[%s1145_s29 + $0x48] sm:$0xff] %v903_v36   ;;  %v858_v41 = vpack.c.bf16 %v405_v37, %v402_v31  ;;  %v898_v42 = vpack.c.bf16 %v469_v38, %v466_v32  ;;  %v426_v47 = vadd.f32 %v981_v39, %v1132_v22 }
  0xe2   : > { %v417_v43 = vpop.f32.mrf.mxu0  ;;  %v481_v44 = vpop.f32.mrf.mxu1  ;;  %v490_v48 = vadd.f32 %v997_v40, %v1132_v22 }
  0xe3   : > { %859 = vst [vmem:[%s1145_s29] sm:$0xff] %v858_v41   ;;  %942 = vst [vmem:[%s1145_s29 + $0x40] sm:$0xff] %v898_v42   ;;  %v418_v51 = vadd.f32 %v1132_v22, %v417_v43  ;;  %v482_v52 = vadd.f32 %v1132_v22, %v481_v44 }
  0xe4   : > { %v982_v45 = vpop.f32.mrf.mxu0  ;;  %v998_v46 = vpop.f32.mrf.mxu1 }
  0xe5   : > { %v429_v49 = vadd.f32 %v982_v45, %v1132_v22  ;;  %v493_v50 = vadd.f32 %v998_v46, %v1132_v22 }
  0xe6   : > { %v420_v53 = vpop.f32.mrf.mxu0  ;;  %v484_v54 = vpop.f32.mrf.mxu1 }
  0xe7   : > { %v873_v55 = vpack.c.bf16 %v429_v49, %v426_v47  ;;  %v913_v56 = vpack.c.bf16 %v493_v50, %v490_v48  ;;  %v421_v57 = vadd.f32 %v1132_v22, %v420_v53  ;;  %v485_v58 = vadd.f32 %v1132_v22, %v484_v54 }
  0xe8   : > { %v985_v59 = vpop.f32.mrf.mxu0  ;;  %v1001_v60 = vpop.f32.mrf.mxu1 }
  0xe9   : > { %937 = vst [vmem:[%s1145_s29 + $0x18] sm:$0xff] %v873_v55   ;;  %945 = vst [vmem:[%s1145_s29 + $0x58] sm:$0xff] %v913_v56   ;;  %v868_v61 = vpack.c.bf16 %v421_v57, %v418_v51  ;;  %v908_v62 = vpack.c.bf16 %v485_v58, %v482_v52  ;;  %v442_v3 = vadd.f32 %v985_v59, %v1132_v22 }
  0xea   : > { %v433_v63 = vpop.f32.mrf.mxu0  ;;  %v497_v0 = vpop.f32.mrf.mxu1  ;;  %v506_v4 = vadd.f32 %v1001_v60, %v1132_v22 }
  0xeb   : > { %936 = vst [vmem:[%s1145_s29 + $0x10] sm:$0xff] %v868_v61   ;;  %944 = vst [vmem:[%s1145_s29 + $0x50] sm:$0xff] %v908_v62   ;;  %v434_v7 = vadd.f32 %v1132_v22, %v433_v63  ;;  %v498_v8 = vadd.f32 %v1132_v22, %v497_v0 }
  0xec   : > { %v986_v1 = vpop.f32.mrf.mxu0  ;;  %v1002_v2 = vpop.f32.mrf.mxu1 }
  0xed   : > { %v445_v5 = vadd.f32 %v986_v1, %v1132_v22  ;;  %v509_v6 = vadd.f32 %v1002_v2, %v1132_v22 }
  0xee   : > { %v436_v9 = vpop.f32.mrf.mxu0  ;;  %v500_v10 = vpop.f32.mrf.mxu1 }
  0xef   : > { %v883_v11 = vpack.c.bf16 %v445_v5, %v442_v3  ;;  %v923_v12 = vpack.c.bf16 %v509_v6, %v506_v4  ;;  %v437_v13 = vadd.f32 %v1132_v22, %v436_v9  ;;  %v501_v14 = vadd.f32 %v1132_v22, %v500_v10 }
  0xf0   : > { %v989_v15 = vpop.f32.mrf.mxu0  ;;  %v1005_v16 = vpop.f32.mrf.mxu1 }
  0xf1   : > { %939 = vst [vmem:[%s1145_s29 + $0x28] sm:$0xff] %v883_v11   ;;  %947 = vst [vmem:[%s1145_s29 + $0x68] sm:$0xff] %v923_v12   ;;  %v878_v17 = vpack.c.bf16 %v437_v13, %v434_v7  ;;  %v918_v18 = vpack.c.bf16 %v501_v14, %v498_v8  ;;  %v458_v24 = vadd.f32 %v989_v15, %v1132_v22 }
  0xf2   : > { %v449_v19 = vpop.f32.mrf.mxu0  ;;  %v513_v20 = vpop.f32.mrf.mxu1  ;;  %v522_v25 = vadd.f32 %v1005_v16, %v1132_v22 }
  0xf3   : > { %938 = vst [vmem:[%s1145_s29 + $0x20] sm:$0xff] %v878_v17   ;;  %946 = vst [vmem:[%s1145_s29 + $0x60] sm:$0xff] %v918_v18   ;;  %v450_v28 = vadd.f32 %v1132_v22, %v449_v19  ;;  %v514_v29 = vadd.f32 %v1132_v22, %v513_v20 }
  0xf4   : > { %v990_v21 = vpop.f32.mrf.mxu0  ;;  %v1006_v23 = vpop.f32.mrf.mxu1 }
  0xf5   : > { %v461_v26 = vadd.f32 %v990_v21, %v1132_v22  ;;  %v525_v27 = vadd.f32 %v1006_v23, %v1132_v22 }
  0xf6   : > { %v452_v30 = vpop.f32.mrf.mxu0  ;;  %v516_v31 = vpop.f32.mrf.mxu1 }
  0xf7   : > { %v893_v32 = vpack.c.bf16 %v461_v26, %v458_v24  ;;  %v933_v33 = vpack.c.bf16 %v525_v27, %v522_v25  ;;  %v453_v34 = vadd.f32 %v1132_v22, %v452_v30  ;;  %v517_v35 = vadd.f32 %v1132_v22, %v516_v31 }
  0xf9   : > { %941 = vst [vmem:[%s1145_s29 + $0x38] sm:$0xff] %v893_v32   ;;  %949 = vst [vmem:[%s1145_s29 + $0x78] sm:$0xff] %v933_v33   ;;  %v888_v36 = vpack.c.bf16 %v453_v34, %v450_v28  ;;  %v928_v37 = vpack.c.bf16 %v517_v35, %v514_v29 }
  0xfb   : > { %940 = vst [vmem:[%s1145_s29 + $0x30] sm:$0xff] %v888_v36   ;;  %948 = vst [vmem:[%s1145_s29 + $0x70] sm:$0xff] %v928_v37  }
  0xfc PF: > { %s13_s12 = sadd.s32 1, %s1048_s12  }
  0xfd   : > { %p10_p4 = scmp.ge.s32.totalorder %s13_s12, 4  }
  0xff   :  { %12 = sbr.rel (!%p10_p4) target bundleno = 1 (0x1), region = 62 }

</bundles_post_ra>
